<compile_context>
chip_gen: v5e
topology: v5e:2x2
jax: 0.10.0
libtpu: 0.0.40
codegen_flags: <defaults>
</compile_context>

<pallas_src>
import functools

import jax
import jax.numpy as jnp
from jax.experimental import pallas as pl
from jax.experimental.pallas import tpu as pltpu


def _adaptive_span_kernel(mask_ref, attn_ref, out_ref, *, normalize):
    # mask_ref : VMEM (1, Lp)   per-(batch*head) soft-ramp mask row (attn dtype)
    # attn_ref : VMEM (TM, Lp)  one M-tile slab of attention weights
    y = attn_ref[...] * mask_ref[...]                       # broadcast over rows
    if normalize:
        # Row sum with f32 accumulation (no slab-sized f32 temporary for f32
        # inputs); exact reciprocal keeps 1e-5 tolerance vs the divide reference.
        denom = jnp.sum(y, axis=-1, keepdims=True, dtype=jnp.float32) + 1e-8
        inv = pl.reciprocal(denom, approx=False)
        y = y * inv.astype(y.dtype)
    out_ref[...] = y


def adaptive_span_forward(attn, current_val, mask_template, *,
                          max_span, ramp, normalize=False,
                          slab_cap_bytes=2 * 1024 * 1024,
                          vmem_limit_bytes=32 * 1024 * 1024):
    """attn: (B, H, M, L) with L <= max_span; current_val: (H,1,1); mask_template: (max_span,)."""
    B, H, M, L = attn.shape
    assert L <= max_span
    dtype = attn.dtype
    itemsize = jnp.dtype(dtype).itemsize
    sub = {4: 8, 2: 16, 1: 32}.get(itemsize, 8)        # sublane quantum per dtype

    # --- precompute the per-head mask once in plain JAX, pre-cast to attn dtype ---
    # PyTorch slices mask[:, :, -L:] when x.size(-1) < max_size -> last L entries.
    tmpl = mask_template[-L:].astype(jnp.float32)                        # (L,)
    cur = current_val.reshape(H, 1).astype(jnp.float32)                  # (H, 1)
    mask = jnp.clip((tmpl[None, :] + cur * float(max_span)) / float(ramp) + 1.0,
                    0.0, 1.0).astype(dtype)                              # (H, L)

    # --- lane-dense L (multiple of 128) and sublane-aligned M, zero-padded ---
    Lp = max(128, pl.cdiv(L, 128) * 128)
    Mp = pl.cdiv(M, sub) * sub

    # --- pick TM: ~2 MiB slabs (HBM-roofline plateau), >= 4 grid steps if possible ---
    row_bytes = Lp * itemsize
    TM = max(sub, ((slab_cap_bytes // row_bytes) // sub) * sub)
    TM = int(min(Mp, TM))
    while (B * H) * pl.cdiv(Mp, TM) < 4 and TM > sub:   # keep both v7x TCs busy
        TM = max(sub, ((TM // 2) // sub) * sub)
    Mp = pl.cdiv(Mp, TM) * TM                           # TM always divides Mp
    grid_m = Mp // TM

    # --- reshape to (B*H, M, L) for contiguous per-step DMA; zero-pad M / L ---
    attn_r = attn.reshape(B * H, M, L)
    if (Mp, Lp) != (M, L):
        attn_r = jnp.pad(attn_r, ((0, 0), (0, Mp - M), (0, Lp - L)))
    mask_bh = jnp.broadcast_to(
        jnp.pad(mask, ((0, 0), (0, Lp - L)))[None, :, None, :],
        (B, H, 1, Lp)).reshape(B * H, 1, Lp)

    kernel = functools.partial(_adaptive_span_kernel, normalize=normalize)

    out = pl.pallas_call(
        kernel,
        out_shape=jax.ShapeDtypeStruct((B * H, Mp, Lp), dtype),
        grid_spec=pl.GridSpec(
            grid=(B * H, grid_m),
            in_specs=[
                pl.BlockSpec((None, 1, Lp), lambda i, m: (i, 0, 0)),   # mask row
                pl.BlockSpec((None, TM, Lp), lambda i, m: (i, m, 0)),  # attn slab
            ],
            out_specs=pl.BlockSpec((None, TM, Lp), lambda i, m: (i, m, 0)),
        ),
        compiler_params=pltpu.CompilerParams(
            dimension_semantics=("parallel", "parallel"),
            vmem_limit_bytes=int(vmem_limit_bytes),
        ),
        input_output_aliases={1: 0},   # attn is logically overwritten
    )(mask_bh, attn_r)

    if (Mp, Lp) != (M, L):
        out = out[:, :M, :L]
    return out.reshape(B, H, M, L)


def _reference(attn, current_val, mask_template, *, max_span, ramp, normalize):
    L = attn.shape[-1]
    mask = mask_template + current_val * max_span            # (H,1,max_span)
    mask = mask / ramp + 1.0
    mask = jnp.clip(mask, 0.0, 1.0)
    mask = mask[:, :, -L:]
    out = attn * mask
    if normalize:
        out = out / (jnp.sum(out, axis=-1, keepdims=True) + 1e-8)
    return out


if __name__ == "__main__":
    # Config (synthetic, deterministic): attn_span=128, ramp=32, 4 heads.
    MAX_SPAN = 128
    RAMP = 32
    B, H, M, L = 2, 4, 8, MAX_SPAN

    key = jax.random.PRNGKey(0)
    attn = jax.random.uniform(key, (B, H, M, L), dtype=jnp.float32)

    # Deterministic "parameters" (shapes from AdaptiveMask.__init__):
    #   current_val: (num_heads, 1, 1), mask_template: linspace(1-max_span, 0, max_span)
    current_val = jnp.array([0.1, 0.3, 0.5, 0.8], dtype=jnp.float32).reshape(H, 1, 1)
    mask_template = jnp.linspace(1.0 - MAX_SPAN, 0.0, MAX_SPAN, dtype=jnp.float32)

    out = adaptive_span_forward(attn, current_val, mask_template,
                                max_span=MAX_SPAN, ramp=RAMP, normalize=True)
    out = jax.block_until_ready(out)

    ref = _reference(attn, current_val, mask_template,
                     max_span=MAX_SPAN, ramp=RAMP, normalize=True)

    assert out.shape == (B, H, M, L)
    assert jnp.allclose(out, ref, atol=1e-5, rtol=1e-5), "mismatch vs JAX reference"

    # Also exercise normalize=False path.
    out2 = jax.block_until_ready(
        adaptive_span_forward(attn, current_val, mask_template,
                              max_span=MAX_SPAN, ramp=RAMP, normalize=False))
    ref2 = _reference(attn, current_val, mask_template,
                      max_span=MAX_SPAN, ramp=RAMP, normalize=False)
    assert jnp.allclose(out2, ref2, atol=1e-5, rtol=1e-5), "mismatch (normalize=False)"

    print("KERNEL_OK")
</pallas_src>

<mosaic_0001>
module attributes {stable_mosaic.version = 11 : i64} {
  func.func @_adaptive_span_kernel(%arg0: i32, %arg1: i32, %arg2: memref<1x1x128xf32, #tpu.memory_space<vmem>>, %arg3: memref<1x8x128xf32, #tpu.memory_space<vmem>>, %arg4: memref<1x8x128xf32, #tpu.memory_space<vmem>>) attributes {dimension_semantics = [#tpu.dimension_semantics<parallel>, #tpu.dimension_semantics<parallel>], iteration_bounds = array<i64: 8, 1>, scalar_prefetch = 0 : i64, scratch_operands = 0 : i64, tpu.core_type = #tpu.core_type<tc>, window_params = [{transform_indices = @transform_0, window_bounds = array<i64: 1, 1, 128>}, {transform_indices = @transform_1, window_bounds = array<i64: 1, 8, 128>}, {transform_indices = @transform_2, window_bounds = array<i64: 1, 8, 128>}]} {
    %c0 = arith.constant 0 : index
    %c0_0 = arith.constant 0 : index
    %c0_1 = arith.constant 0 : index
    %0 = vector.load %arg3[%c0, %c0_0, %c0_1] : memref<1x8x128xf32, #tpu.memory_space<vmem>>, vector<1x8x128xf32>
    %1 = vector.shape_cast %0 : vector<1x8x128xf32> to vector<8x128xf32>
    %c0_2 = arith.constant 0 : index
    %c0_3 = arith.constant 0 : index
    %c0_4 = arith.constant 0 : index
    %2 = vector.load %arg2[%c0_2, %c0_3, %c0_4] : memref<1x1x128xf32, #tpu.memory_space<vmem>>, vector<1x1x128xf32>
    %3 = vector.shape_cast %2 : vector<1x1x128xf32> to vector<1x128xf32>
    %4 = vector.broadcast %3 : vector<1x128xf32> to vector<8x128xf32>
    %5 = arith.mulf %1, %4 : vector<8x128xf32>
    %cst = arith.constant dense<0.000000e+00> : vector<8xf32>
    %6 = vector.multi_reduction <add>, %5, %cst [1] : vector<8x128xf32> to vector<8xf32>
    %7 = vector.shape_cast %6 : vector<8xf32> to vector<8x1xf32>
    %cst_5 = arith.constant 9.99999993E-9 : f32
    %8 = vector.broadcast %cst_5 : f32 to vector<8x1xf32>
    %9 = arith.addf %7, %8 : vector<8x1xf32>
    %10 = tpu.reciprocal %9 : vector<8x1xf32> -> vector<8x1xf32>
    %11 = vector.broadcast %10 : vector<8x1xf32> to vector<8x128xf32>
    %12 = arith.mulf %5, %11 : vector<8x128xf32>
    %c0_6 = arith.constant 0 : index
    %c0_7 = arith.constant 0 : index
    %c0_8 = arith.constant 0 : index
    %13 = vector.load %arg4[%c0_6, %c0_7, %c0_8] : memref<1x8x128xf32, #tpu.memory_space<vmem>>, vector<1x8x128xf32>
    %14 = vector.shape_cast %13 : vector<1x8x128xf32> to vector<8x128xf32>
    %15 = vector.shape_cast %12 : vector<8x128xf32> to vector<1x8x128xf32>
    tpu.vector_store %arg4[%c0_6, %c0_7, %c0_8], %15 {strides = array<i32>} : memref<1x8x128xf32, #tpu.memory_space<vmem>>, vector<1x8x128xf32>,
    return
  }
  func.func @transform_0(%arg0: i32, %arg1: i32) -> (i32, i32, i32) {
    %c0_i32 = arith.constant 0 : i32
    %c0_i32_0 = arith.constant 0 : i32
    %c0_i32_1 = arith.constant 0 : i32
    return %arg0, %c0_i32, %c0_i32_0 : i32, i32, i32
  }
  func.func @transform_1(%arg0: i32, %arg1: i32) -> (i32, i32, i32) {
    %c0_i32 = arith.constant 0 : i32
    %c0_i32_0 = arith.constant 0 : i32
    return %arg0, %arg1, %c0_i32 : i32, i32, i32
  }
  func.func @transform_2(%arg0: i32, %arg1: i32) -> (i32, i32, i32) {
    %c0_i32 = arith.constant 0 : i32
    %c0_i32_0 = arith.constant 0 : i32
    return %arg0, %arg1, %c0_i32 : i32, i32, i32
  }
}

</mosaic_0001>

<bundles_post_ra>
// kernel: tpu_custom_call.1
= control target key start
LH: loop header
LB: loop body
LE: loop exit
PB: predicated region body
PF: predicated region fallthrough
CT: control target
= control target key end

     0   :  { %7 = vsyncpa [#allocation3], 0  ;;  %s653_s0 = inlined_call_operand.vmem [shape: f32[8,1,128], index: 0, kind: input, shape index: {}]   ;;  %s654_s1 = inlined_call_operand.hbm [shape: f32[8,8,128], index: 1, kind: input, shape index: {}, may-alias: {1,2}]   ;;  %s655_s2 = inlined_call_operand.hbm [shape: f32[8,8,128], index: 2, kind: output, shape index: {}, may-alias: {1,2}]  }
   0x1   :  { %9 = vsyncpa [#allocation3 + $0x1], 0 }
   0x2   :  { %10 = vsyncpa [#allocation4], 0 }
   0x3   :  { %12 = vsyncpa [#allocation4 + $0x1], 0  ;;  %s530_s9 = smov 0   ;;  %s532_s10 = smov 0  }
   0x4   :  { %s534_s11 = smov 0   ;;  %s536_s12 = smov 0  }
   0x5   :  { %s538_s13 = smov 0   ;;  %s540_s14 = smov 0  }
   0x6 LB: > { %s323_s15 = sadd.s32 4294967295, %s513_s14   ;;  %s324_s16 = sadd.s32 4294967294, %s513_s14   ;;  %s513_s14 = sphi %s540_s14, %s18_s14   ;;  %s509_s13 = sphi %s538_s13, %s664_s13   ;;  %s505_s12 = sphi %s536_s12, %s663_s12   ;;  %s501_s11 = sphi %s534_s11, %s662_s11   ;;  %s497_s10 = sphi %s532_s10, %s661_s10   ;;  %s493_s9 = sphi %s530_s9, %s660_s9  }
   0x7   : > { %s30_s17 = sadd.s32 1, %s509_s13  ;;  %s65_s18 = sadd.s32 1, %s501_s11 }
   0x8   : > { %p32_p0 = scmp.ge.s32.totalorder %s30_s17, 8  ;;  %p72_p1 = scmp.ne.s32.totalorder %s501_s11, %s497_s10 }
   0x9   : > { %p73_p2 = scmp.eq.s32.totalorder %s513_s14, 0  ;;  %p78_p3 = scmp.ne.s32.totalorder %s497_s10, %s493_s9 }
   0xa   : > { %s666_s17 = smov (%p32_p0, %s30_s17), 0  ;;  %p79_p5 = scmp.eq.s32.totalorder %s323_s15, 0 }
   0xb   : > { %p571_p4 = por %p73_p2, %p72_p1  ;;  %s60_s20 = ssub.s32 %s509_s13, %s666_s17 }
   0xc   : > { %p104_p6 = scmp.eq.s32.totalorder %s323_s15, 7  ;;  %p63_p7 = scmp.eq.s32.totalorder %s60_s20, 0 }
   0xd   : > { %p577_p8 = por %p79_p5, %p78_p3  ;;  %p110_p10 = scmp.eq.s32.totalorder %s324_s16, 7 }
   0xe   : > { %p581_p9 = por %p104_p6, %p72_p1  ;;  %p348_p12 = scmp.lt.s32.totalorder %s513_s14, 8 }
   0xf   : > { %s586_s23 = scalar_select %p63_p7, %s501_s11, %s65_s18  }
  0x10   : > { %p588_p11 = por %p110_p10, %p78_p3  ;;  %s136_s25 = sand.u32 1, %s501_s11  }
  0x11   : > { %s327_s26 = sshll.u32 %s136_s25, 3  ;;  %s328_s27 = sshll.u32 %s509_s13, 3 }
  0x12   : > { %s145_s30 = scalar_lea.hbm %s654_s1, %s328_s27  ;;  %s140_s3 = scalar_lea.vmem [#allocation2], %s327_s26 }
  0x13   : > { %s149_s4 = sshll.u32 %s140_s3, 4  ;;  %s147_s5 = sshll.u32 %s145_s30, 4  ;;  %s150_s4 = int_to_ptr.vmem [resolvable:$true] %s149_s4  ;;  %s148_s5 = int_to_ptr.hbm [resolvable:$true] %s147_s5 }
  0x14   : > { %p341_p13 = pnand %p348_p12, %p571_p4  ;;  %p329_p0 = scmp.ge.s32.totalorder %s513_s14, 1 }
  0x15   : > { %p154_p1 = scmp.lt.s32.totalorder %s513_s14, 9  ;;  %s137_s6 = scalar_lea.sflag [#allocation3], %s136_s25 }
  0x16   : > { %343 = dma.hbm_to_vmem [thread:$0]  (!%p341_p13), %s148_s5, 128, %s150_s4, %s137_s6  }
  0x17   : > { %p155_p2 = pnand %p329_p0, %p154_p1 }
  0x18   : > { %s603_s7 = sand.u32 (!%p155_p2), 1, %s497_s10  }
  0x19   : > { %158 = sbr.rel (%p155_p2) target bundleno = 179 (0xb3), region = 28  ;;  %s330_s8 = sshll.u32 (!%p155_p2), %s603_s7, 3 }
  0x1a   : > { %s161_s15 = scalar_lea.sflag (!%p155_p2), [#allocation3], %s603_s7  ;;  %s164_s16 = scalar_lea.vmem (!%p155_p2), [#allocation2], %s330_s8 }
  0x1e   : > { %484 = dma.done.wait (%p577_p8), %s161_s15, 128  }
  0x1f   : > { %486 = vsyncadd (%p577_p8), %s161_s15, 4294967168  ;;  %p189_p3 = scmp.lt.s32.totalorder %s505_s12, 7  ;;  %v192_v0 = vld [vmem:[%s164_s16] sm:$0xff]  ;;  %s333_s21 = sshll.u32 %s505_s12, 3 }
  0x20   : > { %s229_s28 = scalar_lea.hbm %s655_s2, %s333_s21  ;;  %s188_s29 = scalar_lea.vmem [#allocation5], %s330_s8 }
  0x21   : > { %s190_s18 = scalar_select %p189_p3, %s505_s12, 7 }
  0x22   : > { %s231_s30 = sshll.u32 %s188_s29, 4  ;;  %s233_s3 = sshll.u32 %s229_s28, 4  ;;  %s232_s30 = int_to_ptr.vmem [resolvable:$true] %s231_s30  ;;  %s234_s3 = int_to_ptr.hbm [resolvable:$true] %s233_s3 }
  0x23   : > { %s191_s25 = scalar_lea.vmem %s653_s0, %s190_s18  ;;  %s218_s12 = scalar_lea.sflag [#allocation4], %s603_s7 }
  0x24   : > { %v398_v1 = vld [vmem:[%s191_s25] ss:$0 sm:$0xff]  ;;  %s445_s4 = sshra.s32 %s234_s3, 4  ;;  %s451_s8 = scalar_lea.hbm %s655_s2, 64  ;;  %s446_s4 = int_to_ptr.hbm [resolvable:$true] %s445_s4 }
  0x25   : > { %v197_v2 = vmul.f32 %v398_v1, %v192_v0  ;;  %s447_s5 = scalar_lea.hbm %s446_s4, 8  ;;  %p452_p7 = scmp.lt.s32.totalorder %s446_s4, %s655_s2 }
  0x26   : > { %p448_p4 = scmp.ne.s32.totalorder %s446_s4, %s447_s5  ;;  %p453_p8 = scmp.lt.s32.totalorder %s451_s8, %s447_s5 }
  0x27   : > { %198 = vadd.xlane.f32.xlu0 %v197_v2 }
  0x28   : > { %p449_p5 = pnand %p448_p4, %p581_p9  ;;  %p454_p10 = por %p453_p8, %p452_p7 }
  0x2a   : > { %p450_p6 = pneg %p449_p5 }
  0x2c   : > { %p455_p12 = pnand %p454_p10, %p450_p6 }
  0x9a   : > { %v199_v3 = vpop.xlane.xlu0 %198 }
  0x9b   : > { %v200_v4 = vadd.f32 1e-08, %v199_v3 }
  0x9d   : > { %399 = vrcp.f32 %v200_v4  ;;  %v212_v8 = vand.u32 2147483648, %v200_v4  ;;  %v210_v10 = vand.u32 2147483647, %v200_v4  ;;  %vm206_vm1 = vweird.f32 %v200_v4 }
  0x9f   : > { %v213_v12 = vor.u32 1.1754944e-38, %v212_v8  ;;  %vm211_vm3 = vcmp.eq.f32.partialorder %v210_v10, 8.507059e+37 }
  0xa3   : > { %v400_v5 = vpop.eup %399 }
  0xa4   : > { %v202_v6 = vmul.f32 %v400_v5, %v200_v4  ;;  %vm207_vm0 = vweird.f32 %v400_v5 }
  0xa5   : > { %vm208_vm2 = vmor %vm206_vm1, %vm207_vm0 }
  0xa6   : > { %v203_v7 = vsub.f32 1.0, %v202_v6 }
  0xa8   : > { %v204_v9 = vmul.f32 %v400_v5, %v203_v7 }
  0xaa   : > { %v205_v11 = vadd.f32 %v400_v5, %v204_v9 }
  0xac   : > { %v209_v13 = vsel %vm208_vm2, %v400_v5, %v205_v11 }
  0xad   : > { %v214_v14 = vsel %vm211_vm3, %v213_v12, %v209_v13 }
  0xae   : > { %v215_v15 = vmul.f32 %v214_v14, %v197_v2 }
  0xb0   : > { %216 = vst [vmem:[%s188_s29] sm:$0xff] %v215_v15 }
  0xb1   : > { %458 = shalt.err (!%p455_p12)
}
  0xb2   : > { %338 = dma.vmem_to_hbm [thread:$0]  (%p581_p9), %s232_s30, 128, %s234_s3, %s218_s12  }
  0xb3 PF: > { %p349_p13 = scmp.ge.s32.totalorder %s513_s14, 2  ;;  %s245_s7 = sand.u32 1, %s493_s9  }
  0xb4   : > { %s246_s19 = scalar_lea.sflag [#allocation4], %s245_s7 }
  0xb5   : > { %p345_p0 = pnand %p349_p13, %p588_p11 }
  0xb7   : > { %p346_p1 = pneg %p345_p0 }
  0xb9   : > { %488 = dma.done.wait (%p346_p1), %s246_s19, 128  }
  0xba   : > { %490 = vsyncadd (%p346_p1), %s246_s19, 4294967168  ;;  %s18_s14 = sadd.s32 1, %s513_s14   ;;  %s660_s9 = smov %s497_s10 }
  0xbb   : > { %p15_p2 = scmp.ge.s32.totalorder %s18_s14, 10   ;;  %s661_s10 = smov %s501_s11 }
  0xbc   : > { %s662_s11 = smov %s586_s23  ;;  %s663_s12 = smov %s509_s13 }
  0xbd   : > { %s664_s13 = smov %s666_s17  ;;  %17 = sbr.rel (!%p15_p2) target bundleno = 6 (0x6), region = 76 }
  0xc2   :  { %252 = vsyncpa [#allocation3], 1 }
  0xc3   :  { %254 = vsyncpa [#allocation3 + $0x1], 1 }
  0xc4   :  { %255 = vsyncpa [#allocation4], 1 }
  0xc5   :  { %257 = vsyncpa [#allocation4 + $0x1], 1 }

</bundles_post_ra>
